<compile_context>
chip_gen: v6e
topology: v6e:2x2x1
jax: 0.10.0
libtpu: 0.0.40
codegen_flags: <defaults>
</compile_context>

<pallas_src>
import functools

import jax
import jax.numpy as jnp
from jax import lax
from jax.experimental import pallas as pl
from jax.experimental.pallas import tpu as pltpu

LANES = 128
SUBLANES = 8
MAX_TILE_ROWS = 4096      # (4096, 128) f32 block = 2 MiB; ~8 MiB resident with
                          # 2 inputs x 2 pipeline buffers.
CHUNK_ROWS = 512          # inner-loop chunk: keeps live f32 temporaries ~2 MiB.
_PAD_X = -1e9             # focal loss at (x = -1e9, t = 0) is exactly 0.


def _round_up(a, m):
    return ((a + m - 1) // m) * m


def _focal_loss_kernel(x_ref, t_ref, acc_ref, *, alpha, gamma, rows, tile_rows,
                       chunk_rows, steps, num_blocks, total_blocks):
    s = pl.program_id(0)
    k = pl.program_id(1)
    blk = s * steps + k                      # logical block index (pre-clamp)

    # Zero this split's resident accumulator at the start of its reduction.
    @pl.when(k == 0)
    def _():
        acc_ref[...] = jnp.zeros_like(acc_ref)

    def chunk_psum(row0, valid_rows):
        """Focal loss over rows [row0, row0+chunk_rows), folded to (8, 128)."""
        x = x_ref[pl.ds(row0, chunk_rows), :].astype(jnp.float32)
        t = t_ref[pl.ds(row0, chunk_rows), :].astype(jnp.float32)

        # Numerically stable binary_cross_entropy_with_logits (reduction='none'):
        #   bce = max(x, 0) - x*t + log1p(exp(-|x|))
        z = jnp.exp(-jnp.abs(x))                              # EUP #1
        bce = jnp.maximum(x, 0.0) - x * t + jnp.log1p(z)      # EUP #2 (log1p)

        # pt = exp(-bce): a 3rd EUP op (EUP has slack even on v7x) instead of
        # the compare/select/reciprocal chain that can push the VALU slot.
        pt = jnp.exp(-bce)                                    # EUP #3

        # at = alpha_table.gather(targets.long()), alpha_table = [alpha, 1-alpha].
        # torch truncates t to int, so t >= 1 selects (1 - alpha).
        at = jnp.where(t >= 1.0, 1.0 - alpha, alpha)

        one_m_pt = 1.0 - pt
        if isinstance(gamma, (int, float)) and float(gamma).is_integer() and 0 <= gamma <= 8:
            gi = int(gamma)                                   # unrolled VPU multiplies
            mod = jnp.ones_like(one_m_pt) if gi == 0 else one_m_pt
            for _ in range(max(gi - 1, 0)):
                mod = mod * one_m_pt
        else:
            mod = one_m_pt ** gamma                           # generic fallback

        f = at * mod * bce                                    # (chunk_rows, 128) f32

        if valid_rows is not None:
            # Mask garbage rows of the partial last block (Pallas gives no
            # guarantee about un-DMA'd rows of a partial block).
            rid = lax.broadcasted_iota(jnp.int32, (chunk_rows, LANES), 0)
            f = jnp.where(rid < valid_rows, f, 0.0)

        # Lane-wise fold with pure vreg adds; cross-lane reduce happens once
        # in the wrapper.
        return f.reshape(chunk_rows // SUBLANES, SUBLANES, LANES).sum(axis=0)

    n_chunks = tile_rows // chunk_rows
    rem = rows % tile_rows                    # trace-time Python int
    last_full_blocks = num_blocks if rem == 0 else num_blocks - 1

    def accumulate_full_block():
        @pl.loop(0, n_chunks)
        def _(c):
            row0 = pl.multiple_of(c * chunk_rows, chunk_rows)
            acc_ref[...] += chunk_psum(row0, None)

    if rem == 0 and total_blocks == num_blocks:
        # Every grid step covers a full, valid block: no masking at all.
        accumulate_full_block()
    else:
        if last_full_blocks > 0:
            @pl.when(blk < last_full_blocks)
            def _():
                accumulate_full_block()

        if rem != 0:
            @pl.when(blk == num_blocks - 1)
            def _():
                full_c = rem // chunk_rows
                tail = rem % chunk_rows
                if full_c > 0:
                    @pl.loop(0, full_c)
                    def _(c):
                        row0 = pl.multiple_of(c * chunk_rows, chunk_rows)
                        acc_ref[...] += chunk_psum(row0, None)
                if tail > 0:
                    acc_ref[...] += chunk_psum(full_c * chunk_rows, tail)
        # blk >= num_blocks (clamped redundant step, odd block count) falls
        # through both gates and contributes nothing.


def weighted_focal_loss(inputs, targets, alpha=0.25, gamma=2):
    """Pallas TPU implementation of WeightedFocalLoss.forward (mean focal loss).

    Targets are expected to be hard binary labels (0/1), as in the PyTorch
    module (which gathers alpha with integer-cast targets).
    """
    x = jnp.reshape(inputs, (-1,))
    t = jnp.reshape(targets, (-1,))
    n = x.shape[0]
    alpha = float(alpha)

    # Stream cheap native dtypes as-is (no extra wrapper-side HBM pass); the
    # kernel computes in f32 regardless.
    if x.dtype not in (jnp.float32, jnp.bfloat16):
        x = x.astype(jnp.float32)
    if t.dtype == jnp.bool_:
        t = t.astype(jnp.int8)
    elif t.dtype not in (jnp.float32, jnp.bfloat16, jnp.int8, jnp.uint8):
        t = t.astype(jnp.float32)

    # Tiny-N fast path: a single-block pallas_call is dominated by launch +
    # pipeline prologue; a fused XLA elementwise+reduce is faster.
    if n < SUBLANES * LANES:
        xf = x.astype(jnp.float32)
        tf = t.astype(jnp.float32)
        bce = jnp.maximum(xf, 0.0) - xf * tf + jnp.log1p(jnp.exp(-jnp.abs(xf)))
        at = jnp.where(tf >= 1.0, 1.0 - alpha, alpha)
        pt = jnp.exp(-bce)
        return jnp.mean(at * (1.0 - pt) ** gamma * bce)

    # Pad only to a multiple of 128 lanes (zero-loss sentinel).  When n is
    # already lane-aligned this is skipped and the reshape is a free view.
    # TODO(synk): for ragged n, CompilerParams(allow_input_fusion=...) could
    # fuse this small pad into the operand instead of materializing a copy.
    pad = (-n) % LANES
    if pad:
        x = jnp.pad(x, (0, pad), constant_values=_PAD_X)
        t = jnp.pad(t, (0, pad), constant_values=0)
    rows = (n + pad) // LANES

    # Tile / split selection.  Row-level raggedness (rows % tile_rows != 0) is
    # handled in-kernel; no further padding.
    if rows >= CHUNK_ROWS:
        tile_rows = min(MAX_TILE_ROWS, _round_up(rows, CHUNK_ROWS))
        chunk_rows = CHUNK_ROWS
    else:
        tile_rows = _round_up(rows, 32)      # multiple of 32: int8/bf16-friendly
        chunk_rows = tile_rows
    num_blocks = pl.cdiv(rows, tile_rows)
    # Give v7x's second TensorCore its own partial-sum block whenever there
    # are >= 2 blocks of work; harmless (serialized) on single-core v5e/v6e.
    num_splits = 2 if num_blocks >= 2 else 1
    steps = pl.cdiv(num_blocks, num_splits)
    total_blocks = num_splits * steps        # may exceed num_blocks by one

    if total_blocks == num_blocks:
        in_idx = lambda s, k, _st=steps: (s * _st + k, 0)
    else:
        # Clamp the (single) overhanging step of an odd block count onto the
        # last valid block; its contribution is gated off in the kernel and
        # the repeated block index lets Pallas skip the DMA.
        in_idx = lambda s, k, _st=steps, _last=num_blocks - 1: (
            jnp.minimum(s * _st + k, _last), 0)

    kernel = functools.partial(
        _focal_loss_kernel, alpha=alpha, gamma=gamma, rows=rows,
        tile_rows=tile_rows, chunk_rows=chunk_rows, steps=steps,
        num_blocks=num_blocks, total_blocks=total_blocks)

    x2 = x.reshape(rows, LANES)
    t2 = t.reshape(rows, LANES)
    bytes_accessed = int(rows * LANES * (x2.dtype.itemsize + t2.dtype.itemsize)
                         + num_splits * SUBLANES * LANES * 4)

    partials = pl.pallas_call(
        kernel,
        out_shape=jax.ShapeDtypeStruct((num_splits * SUBLANES, LANES), jnp.float32),
        grid_spec=pltpu.PrefetchScalarGridSpec(
            num_scalar_prefetch=0,
            grid=(num_splits, steps),
            in_specs=[
                pl.BlockSpec((tile_rows, LANES), in_idx),
                pl.BlockSpec((tile_rows, LANES), in_idx),
            ],
            out_specs=pl.BlockSpec((SUBLANES, LANES), lambda s, k: (s, 0)),
        ),
        compiler_params=pltpu.CompilerParams(
            dimension_semantics=("parallel", "arbitrary"),
            vmem_limit_bytes=32 * 1024 * 1024,
        ),
        cost_estimate=pl.CostEstimate(
            flops=14 * rows * LANES,
            transcendentals=3 * rows * LANES,   # exp, log1p, exp
            bytes_accessed=bytes_accessed,
        ),
    )(x2, t2)

    # Single cross-lane reduce + mean; padded/masked tail contributed exactly 0.
    return jnp.sum(partials) / jnp.float32(n)


def _reference(inputs, targets, alpha=0.25, gamma=2):
    """Pure-JAX mirror of the PyTorch WeightedFocalLoss.forward."""
    x = jnp.reshape(inputs, (-1,)).astype(jnp.float32)
    t = jnp.reshape(targets, (-1,)).astype(jnp.float32)
    bce = jnp.maximum(x, 0.0) - x * t + jnp.log1p(jnp.exp(-jnp.abs(x)))
    at = jnp.where(t >= 1.0, 1.0 - alpha, alpha)
    pt = jnp.exp(-bce)
    return jnp.mean(at * (1.0 - pt) ** gamma * bce)


if __name__ == "__main__":
    key = jax.random.PRNGKey(0)
    k_x, k_t = jax.random.split(key)

    # Small 4-D logits / binary targets (batch=2, channels=4, 16x16 spatial).
    shape = (2, 4, 16, 16)                                   # 2048 elements
    inputs = jax.random.normal(k_x, shape, dtype=jnp.float32)
    targets = jax.random.bernoulli(k_t, p=0.3, shape=shape).astype(jnp.float32)

    loss = jax.block_until_ready(weighted_focal_loss(inputs, targets, alpha=0.25, gamma=2))
    ref = _reference(inputs, targets, alpha=0.25, gamma=2)
    assert jnp.allclose(loss, ref, rtol=1e-3, atol=1e-6), (loss, ref)

    # A larger ragged size exercising: lane padding (n % 128 != 0), the 2-way
    # split with an odd block count (clamped redundant step), the masked
    # partial last block, and int8 target streaming.
    k_x2, k_t2 = jax.random.split(jax.random.PRNGKey(1))
    N2 = 2 * MAX_TILE_ROWS * LANES + 300
    x_big = jax.random.normal(k_x2, (N2,), dtype=jnp.float32)
    t_big = jax.random.bernoulli(k_t2, p=0.5, shape=(N2,)).astype(jnp.int8)
    loss_big = jax.block_until_ready(weighted_focal_loss(x_big, t_big))
    ref_big = _reference(x_big, t_big)
    assert jnp.allclose(loss_big, ref_big, rtol=1e-3, atol=1e-6), (loss_big, ref_big)

    print("KERNEL_OK")
</pallas_src>

<mosaic_0001>
module attributes {stable_mosaic.version = 11 : i64} {
  func.func @_focal_loss_kernel(%arg0: i32, %arg1: i32, %arg2: memref<32x128xf32, #tpu.memory_space<vmem>>, %arg3: memref<32x128xf32, #tpu.memory_space<vmem>>, %arg4: memref<8x128xf32, #tpu.memory_space<vmem>>) attributes {dimension_semantics = [#tpu.dimension_semantics<parallel>, #tpu.dimension_semantics<arbitrary>], iteration_bounds = array<i64: 1, 1>, scalar_prefetch = 0 : i64, scratch_operands = 0 : i64, tpu.core_type = #tpu.core_type<tc>, window_params = [{transform_indices = @transform_0, window_bounds = array<i64: 32, 128>}, {transform_indices = @transform_1, window_bounds = array<i64: 32, 128>}, {transform_indices = @transform_2, window_bounds = array<i64: 8, 128>}]} {
    %c1_i32 = arith.constant 1 : i32
    %0 = arith.muli %arg0, %c1_i32 : i32
    %1 = arith.addi %0, %arg1 : i32
    %c0_i32 = arith.constant 0 : i32
    %2 = arith.cmpi eq, %arg1, %c0_i32 : i32
    %3 = arith.extui %2 : i1 to i32
    %c0_i32_0 = arith.constant 0 : i32
    %4 = arith.cmpi ne, %3, %c0_i32_0 : i32
    scf.if %4 {
      %cst = arith.constant 0.000000e+00 : f32
      %8 = vector.broadcast %cst : f32 to vector<8x128xf32>
      %c0 = arith.constant 0 : index
      %c0_3 = arith.constant 0 : index
      %9 = vector.load %arg4[%c0, %c0_3] : memref<8x128xf32, #tpu.memory_space<vmem>>, vector<8x128xf32>
      tpu.vector_store %arg4[%c0, %c0_3], %8 {strides = array<i32>} : memref<8x128xf32, #tpu.memory_space<vmem>>, vector<8x128xf32>,
    } else {
    }
    %c0_i32_1 = arith.constant 0 : i32
    %5 = arith.cmpi eq, %1, %c0_i32_1 : i32
    %6 = arith.extui %5 : i1 to i32
    %c0_i32_2 = arith.constant 0 : i32
    %7 = arith.cmpi ne, %6, %c0_i32_2 : i32
    scf.if %7 {
      %c0 = arith.constant 0 : index
      %c0_3 = arith.constant 0 : index
      %8 = vector.load %arg4[%c0, %c0_3] : memref<8x128xf32, #tpu.memory_space<vmem>>, vector<8x128xf32>
      %c0_4 = arith.constant 0 : index
      %c0_5 = arith.constant 0 : index
      %9 = vector.load %arg2[%c0_4, %c0_5] : memref<32x128xf32, #tpu.memory_space<vmem>>, vector<32x128xf32>
      %c0_6 = arith.constant 0 : index
      %c0_7 = arith.constant 0 : index
      %10 = vector.load %arg3[%c0_6, %c0_7] : memref<32x128xf32, #tpu.memory_space<vmem>>, vector<32x128xf32>
      %11 = math.absf %9 : vector<32x128xf32>
      %cst = arith.constant 0.000000e+00 : f32
      %12 = vector.broadcast %cst : f32 to vector<32x128xf32>
      %13 = arith.subf %12, %11 : vector<32x128xf32>
      %14 = math.exp %13 : vector<32x128xf32>
      %cst_8 = arith.constant 0.000000e+00 : f32
      %15 = vector.broadcast %cst_8 : f32 to vector<32x128xf32>
      %16 = arith.maximumf %9, %15 : vector<32x128xf32>
      %17 = arith.mulf %9, %10 : vector<32x128xf32>
      %18 = arith.subf %16, %17 : vector<32x128xf32>
      %19 = math.log1p %14 : vector<32x128xf32>
      %20 = arith.addf %18, %19 : vector<32x128xf32>
      %cst_9 = arith.constant 0.000000e+00 : f32
      %21 = vector.broadcast %cst_9 : f32 to vector<32x128xf32>
      %22 = arith.subf %21, %20 : vector<32x128xf32>
      %23 = math.exp %22 : vector<32x128xf32>
      %cst_10 = arith.constant 1.000000e+00 : f32
      %24 = vector.broadcast %cst_10 : f32 to vector<32x128xf32>
      %25 = arith.cmpf oge, %10, %24 : vector<32x128xf32>
      %cst_11 = arith.constant 7.500000e-01 : f32
      %cst_12 = arith.constant 2.500000e-01 : f32
      %26 = vector.broadcast %cst_11 : f32 to vector<32x128xf32>
      %27 = vector.broadcast %cst_12 : f32 to vector<32x128xf32>
      %28 = arith.select %25, %26, %27 : vector<32x128xi1>, vector<32x128xf32>
      %cst_13 = arith.constant 1.000000e+00 : f32
      %29 = vector.broadcast %cst_13 : f32 to vector<32x128xf32>
      %30 = arith.subf %29, %23 : vector<32x128xf32>
      %31 = arith.mulf %30, %30 : vector<32x128xf32>
      %32 = arith.mulf %28, %31 : vector<32x128xf32>
      %33 = arith.mulf %32, %20 : vector<32x128xf32>
      %34 = tpu.iota {dimensions = array<i32: 0>} : vector<32x128xi32>
      %c16_i32 = arith.constant 16 : i32
      %35 = vector.broadcast %c16_i32 : i32 to vector<32x128xi32>
      %36 = arith.cmpi slt, %34, %35 : vector<32x128xi32>
      %cst_14 = arith.constant 0.000000e+00 : f32
      %37 = vector.broadcast %cst_14 : f32 to vector<32x128xf32>
      %38 = arith.select %36, %33, %37 : vector<32x128xi1>, vector<32x128xf32>
      %39 = vector.shape_cast %38 : vector<32x128xf32> to vector<4x8x128xf32>
      %cst_15 = arith.constant dense<0.000000e+00> : vector<8x128xf32>
      %40 = vector.multi_reduction <add>, %39, %cst_15 [0] : vector<4x8x128xf32> to vector<8x128xf32>
      %41 = arith.addf %8, %40 : vector<8x128xf32>
      %c0_16 = arith.constant 0 : index
      %c0_17 = arith.constant 0 : index
      %42 = vector.load %arg4[%c0_16, %c0_17] : memref<8x128xf32, #tpu.memory_space<vmem>>, vector<8x128xf32>
      tpu.vector_store %arg4[%c0_16, %c0_17], %41 {strides = array<i32>} : memref<8x128xf32, #tpu.memory_space<vmem>>, vector<8x128xf32>,
    } else {
    }
    return
  }
  func.func @transform_0(%arg0: i32, %arg1: i32) -> (i32, i32) {
    %c1_i32 = arith.constant 1 : i32
    %0 = arith.muli %arg0, %c1_i32 : i32
    %1 = arith.addi %0, %arg1 : i32
    %c0_i32 = arith.constant 0 : i32
    %c0_i32_0 = arith.constant 0 : i32
    return %1, %c0_i32 : i32, i32
  }
  func.func @transform_1(%arg0: i32, %arg1: i32) -> (i32, i32) {
    %c1_i32 = arith.constant 1 : i32
    %0 = arith.muli %arg0, %c1_i32 : i32
    %1 = arith.addi %0, %arg1 : i32
    %c0_i32 = arith.constant 0 : i32
    %c0_i32_0 = arith.constant 0 : i32
    return %1, %c0_i32 : i32, i32
  }
  func.func @transform_2(%arg0: i32, %arg1: i32) -> (i32, i32) {
    %c0_i32 = arith.constant 0 : i32
    %c0_i32_0 = arith.constant 0 : i32
    return %arg0, %c0_i32 : i32, i32
  }
}

</mosaic_0001>

<bundles_post_ra>
// kernel: tpu_custom_call.1
= control target key start
LH: loop header
LB: loop body
LE: loop exit
PB: predicated region body
PF: predicated region fallthrough
CT: control target
= control target key end

     0   :  { %7 = vsyncpa [#allocation3], 0  ;;  %s336_s0 = inlined_call_operand.hbm [shape: f32[16,128], index: 0, kind: input, shape index: {}]   ;;  %s337_s1 = inlined_call_operand.hbm [shape: f32[16,128], index: 1, kind: input, shape index: {}]   ;;  %s338_s2 = inlined_call_operand.hbm [shape: f32[8,128], index: 2, kind: output, shape index: {}]  }
   0x1   :  { %8 = vsyncpa [#allocation6], 0 }
   0x2   :  { %9 = vsyncpa [#allocation4], 0 }
   0x3   :  { %18 = vsyncadd [#allocation3], 256  ;;  %s306_s9 = smov [#allocation2]  }
   0x4   :  { %s23_s10 = sshll.u32 %s306_s9, 4  ;;  %s24_s10 = int_to_ptr.vmem [resolvable:$true] %s23_s10 }
   0x5   :  { %s248_s11 = scalar_lea.vmem %s24_s10, 256  ;;  %s252_s12 = scalar_lea.vmem %s24_s10, 512 }
   0x6   :  { %p249_p0 = scmp.ne.s32.totalorder %s24_s10, %s248_s11  ;;  %p253_p1 = scmp.lt.s32.totalorder %s24_s10, %s24_s10 }
   0x7   :  { %p254_p2 = scmp.lt.s32.totalorder %s252_s12, %s248_s11 }
   0x9   :  { %p255_p3 = por %p254_p2, %p253_p1 }
   0xb   :  { %p256_p4 = pnand %p255_p3, %p249_p0 }
   0xd   :  { %259 = shalt.err (!%p256_p4)
}
   0xe   :  { %s307_s13 = smov 128   ;;  %s308_s14 = smov 8  }
   0xf   :  { %29 = dma.hbm_to_vmem [thread:$0]  %s336_s0, 256, %s24_s10, [#allocation3], %s307_s13, %s307_s13, %s308_s14  }
  0x10   :  { %38 = vsyncadd [#allocation6], 256  ;;  %s309_s17 = smov [#allocation5]  }
  0x11   :  { %s43_s18 = sshll.u32 %s309_s17, 4  ;;  %s44_s18 = int_to_ptr.vmem [resolvable:$true] %s43_s18 }
  0x12   :  { %s268_s19 = scalar_lea.vmem %s44_s18, 256  ;;  %s272_s20 = scalar_lea.vmem %s44_s18, 512 }
  0x13   :  { %p269_p5 = scmp.ne.s32.totalorder %s44_s18, %s268_s19  ;;  %p273_p6 = scmp.lt.s32.totalorder %s44_s18, %s44_s18 }
  0x14   :  { %p274_p7 = scmp.lt.s32.totalorder %s272_s20, %s268_s19 }
  0x16   :  { %p275_p8 = por %p274_p7, %p273_p6 }
  0x18   :  { %p276_p9 = pnand %p275_p8, %p269_p5 }
  0x1a   :  { %279 = shalt.err (!%p276_p9)
}
  0x1b   :  { %49 = dma.hbm_to_vmem [thread:$0]  %s337_s1, 256, %s44_s18, [#allocation6], %s307_s13, %s307_s13, %s308_s14  }
  0x1c   :  { %300 = dma.done.wait [#allocation3], 512  }
  0x1d   :  { %301 = vsyncadd [#allocation3], 4294966784 }
  0x1e   :  { %302 = dma.done.wait [#allocation6], 512  }
  0x1f   :  { %303 = vsyncadd [#allocation6], 4294966784  ;;  %v75_v0 = vld [vmem:[#allocation2] sm:$0xff]  ;;  %v76_v1 = vld [vmem:[#allocation2 + $0x8] sm:$0xff]  ;;  %v310_v43 = vmov 0.25   ;;  %s311_s0 = smov [#allocation7]  }
  0x20   :  { %v83_v2 = vand.u32 2147483647, %v75_v0  ;;  %v84_v3 = vand.u32 2147483647, %v76_v1  ;;  %v79_v14 = vld [vmem:[#allocation5] sm:$0xff]  ;;  %v80_v15 = vld [vmem:[#allocation5 + $0x8] sm:$0xff] }
  0x21   :  { %v99_v17 = vmax.f32 %v75_v0, 0.0  ;;  %v103_v18 = vmul.f32 %v79_v14, %v75_v0  ;;  %v100_v21 = vmax.f32 %v76_v1, 0.0  ;;  %v104_v22 = vmul.f32 %v80_v15, %v76_v1  ;;  %s211_s1 = sshll.u32 %s311_s0, 4  ;;  %s212_s1 = int_to_ptr.vmem [resolvable:$true] %s211_s1 }
  0x22   :  { %v87_v4 = vsub.f32 0.0, %v83_v2  ;;  %v88_v5 = vsub.f32 0.0, %v84_v3  ;;  %vm163_vm2 = vcmp.ge.f32.partialorder %v79_v14, 1.0  ;;  %vm164_vm3 = vcmp.ge.f32.partialorder %v80_v15, 1.0  ;;  %s280_s23 = scalar_lea.vmem %s212_s1, 128  ;;  %p285_p11 = scmp.lt.s32.totalorder %s212_s1, %s212_s1 }
  0x23   :  { %v107_v26 = vsub.f32 %v99_v17, %v103_v18  ;;  %v108_v29 = vsub.f32 %v100_v21, %v104_v22  ;;  %v167_v44 = vsel %vm163_vm2, 0.75, %v310_v43  ;;  %v168_v46 = vsel %vm164_vm3, 0.75, %v310_v43  ;;  %p281_p10 = scmp.ne.s32.totalorder %s212_s1, %s280_s23  ;;  %p286_p12 = scmp.lt.s32.totalorder %s280_s23, %s280_s23 }
  0x24   :  { %v91_v6 = vmul.f32 1.442695, %v87_v4  ;;  %v93_v7 = vmul.f32 1.442695, %v88_v5 }
  0x25   :  { %p287_p13 = por %p286_p12, %p285_p11 }
  0x26   :  { %228 = vpow2.f32 %v91_v6 }
  0x27   :  { %230 = vpow2.f32 %v93_v7  ;;  %p288_p0 = pnand %p287_p13, %p281_p10 }
  0x33   :  { %v229_v8 = vpop.eup %228 }
  0x34   :  { %v231_v9 = vpop.eup %230  ;;  %v111_v10 = vadd.f32 1.0, %v229_v8  ;;  %v114_v12 = vmul.f32 -0.5, %v229_v8  ;;  %v117_v19 = vand.u32 2147483647, %v229_v8 }
  0x35   :  { %v120_v11 = vadd.f32 1.0, %v231_v9  ;;  %v123_v13 = vmul.f32 -0.5, %v231_v9  ;;  %v126_v23 = vand.u32 2147483647, %v231_v9 }
  0x36   :  { %232 = vlog2.f32 %v111_v10  ;;  %v115_v16 = vadd.f32 1.0, %v114_v12  ;;  %vm118_vm0 = vcmp.lt.f32.partialorder %v117_v19, 0.0004427343 }
  0x37   :  { %234 = vlog2.f32 %v120_v11  ;;  %v124_v20 = vadd.f32 1.0, %v123_v13  ;;  %vm127_vm1 = vcmp.lt.f32.partialorder %v126_v23, 0.0004427343 }
  0x38   :  { %v116_v24 = vmul.f32 %v229_v8, %v115_v16 }
  0x39   :  { %v125_v27 = vmul.f32 %v231_v9, %v124_v20 }
  0x43   :  { %v233_v25 = vpop.eup %232 }
  0x44   :  { %v235_v28 = vpop.eup %234  ;;  %v113_v30 = vmul.f32 0.6931472, %v233_v25 }
  0x45   :  { %v122_v31 = vmul.f32 0.6931472, %v235_v28 }
  0x46   :  { %v119_v32 = vsel %vm118_vm0, %v116_v24, %v113_v30 }
  0x47   :  { %v128_v33 = vsel %vm127_vm1, %v125_v27, %v122_v31  ;;  %v147_v34 = vadd.f32 %v119_v32, %v107_v26 }
  0x48   :  { %v148_v35 = vadd.f32 %v128_v33, %v108_v29 }
  0x49   :  { %v151_v36 = vsub.f32 0.0, %v147_v34 }
  0x4a   :  { %v152_v37 = vsub.f32 0.0, %v148_v35 }
  0x4b   :  { %v155_v38 = vmul.f32 1.442695, %v151_v36 }
  0x4c   :  { %v157_v39 = vmul.f32 1.442695, %v152_v37 }
  0x4d   :  { %236 = vpow2.f32 %v155_v38 }
  0x4e   :  { %238 = vpow2.f32 %v157_v39 }
  0x5a   :  { %v237_v40 = vpop.eup %236 }
  0x5b   :  { %v239_v41 = vpop.eup %238  ;;  %v171_v42 = vsub.f32 1.0, %v237_v40 }
  0x5c   :  { %v172_v45 = vsub.f32 1.0, %v239_v41 }
  0x5d   :  { %v175_v47 = vmul.f32 %v171_v42, %v171_v42 }
  0x5e   :  { %v176_v48 = vmul.f32 %v172_v45, %v172_v45 }
  0x5f   :  { %v179_v49 = vmul.f32 %v175_v47, %v167_v44 }
  0x60   :  { %v180_v50 = vmul.f32 %v176_v48, %v168_v46 }
  0x61   :  { %v183_v51 = vmul.f32 %v179_v49, %v147_v34 }
  0x62   :  { %v184_v52 = vmul.f32 %v180_v50, %v148_v35 }
  0x64   :  { %v200_v53 = vadd.f32 %v184_v52, %v183_v51 }
  0x66   :  { %204 = vst [vmem:[#allocation7] sm:$0xff] %v200_v53 }
  0x67   :  { %291 = shalt.err (!%p288_p0)
}
  0x68   :  { %214 = dma.vmem_to_hbm [thread:$0]  %s212_s1, 128, %s338_s2, [#allocation4]  }
  0x69   :  { %304 = dma.done.wait [#allocation4], 128  }
  0x6a   :  { %305 = vsyncadd [#allocation4], 4294967168 }
  0x6b   :  { %218 = vsyncpa [#allocation3], 1 }
  0x6c   :  { %219 = vsyncpa [#allocation6], 1 }
  0x6d   :  { %220 = vsyncpa [#allocation4], 1 }

</bundles_post_ra>
